<compile_context>
chip_gen: v7x
topology: tpu7x:2x2x1
jax: 0.10.0
libtpu: 0.0.40
codegen_flags: <defaults>
</compile_context>

<pallas_src>
import jax
import jax.numpy as jnp
from jax import lax
from jax.experimental import pallas as pl
from jax.experimental.pallas import tpu as pltpu

EPS = 1e-5          # PyTorch BatchNorm2d default
LANE = 128          # channel dims are zero-padded to this multiple
STAT_ROWS = 8       # sublane-aligned per-image stat block (rows 0/1 used)


def _round_up(n, m=LANE):
    return ((n + m - 1) // m) * m


def _pad_to(a, shape):
    return jnp.pad(a, [(0, s - d) for d, s in zip(a.shape, shape)])


def _bn_scale_shift(v, gamma, beta):
    """Train-mode BN folded to per-channel scale/shift (used for bn0 on x)."""
    mean = jnp.mean(v, axis=(0, 1, 2))
    var = jnp.var(v, axis=(0, 1, 2))                 # biased, as train-mode BN
    s = gamma * lax.rsqrt(var + EPS)
    t = beta - mean * s
    return s.reshape(1, -1), t.reshape(1, -1)


def _partials_to_scale_shift(partials, count, gamma, beta):
    """Reduce per-image (sum, sumsq) partials -> BN scale/shift (exact train-mode)."""
    tot = jnp.sum(partials, axis=0)                  # (STAT_ROWS, C)
    mean = tot[0] / count
    var = jnp.maximum(tot[1] / count - mean * mean, 0.0)
    s = gamma * lax.rsqrt(var + EPS)
    t = beta - mean * s
    return s.reshape(1, -1), t.reshape(1, -1)


def _write_stats(ref, v):
    """ref block (1, STAT_ROWS, C); v is (rows, C) f32. Rows 0/1 = sum / sumsq."""
    c = v.shape[-1]
    ref[0, 0:1, :] = jnp.sum(v, axis=0, keepdims=True)
    ref[0, 1:2, :] = jnp.sum(v * v, axis=0, keepdims=True)
    ref[0, 2:STAT_ROWS, :] = jnp.zeros((STAT_ROWS - 2, c), jnp.float32)


# --------------------------- stage 1: bn0 + conv1 (+ conv_sc) ---------------
def _make_stage1_kernel(H, W, Ho, Wo, mode):
    HW = H * W

    def kernel(*refs):
        if mode == "identity":
            x_ref, s0_ref, t0_ref, w1_ref, h1_ref, st1_ref = refs
        elif mode == "proj_fused":                  # stride-1 projection
            x_ref, s0_ref, t0_ref, w_ref, h1_ref, sc_ref, st1_ref, stsc_ref = refs
        else:                                        # "proj_split": stride-2 projection
            x_ref, s0_ref, t0_ref, w1_ref, wsc_ref, h1_ref, sc_ref, st1_ref, stsc_ref = refs

        Cp = x_ref.shape[-1]
        Pp = h1_ref.shape[-1]

        pre = jnp.maximum(x_ref[0] * s0_ref[...] + t0_ref[...], 0.0)   # (H,W,Cp) f32
        pre2 = pre.reshape(HW, Cp).astype(jnp.bfloat16)

        if mode == "proj_fused":
            Cop = sc_ref.shape[-1]
            # conv1 and conv_sc fused into one MXU pass over `pre`.
            y = jnp.dot(pre2, w_ref[...], preferred_element_type=jnp.float32)
            h1 = y[:, :Pp]
            sc = y[:, Pp:]
            _write_stats(stsc_ref, sc)
            sc_ref[...] = sc.reshape(1, Ho, Wo, Cop).astype(jnp.bfloat16)
        else:
            h1 = jnp.dot(pre2, w1_ref[...], preferred_element_type=jnp.float32)
            if mode == "proj_split":
                Cop = sc_ref.shape[-1]
                # stride-2 shortcut taps: the wrapper's phase-major layout puts
                # them at the contiguous leading [0:Ho, 0:Wo] block of `pre`.
                pre_s = pre[0:Ho, 0:Wo, :].reshape(Ho * Wo, Cp).astype(jnp.bfloat16)
                sc = jnp.dot(pre_s, wsc_ref[...], preferred_element_type=jnp.float32)
                _write_stats(stsc_ref, sc)
                sc_ref[...] = sc.reshape(1, Ho, Wo, Cop).astype(jnp.bfloat16)

        _write_stats(st1_ref, h1)                                     # f32 stats
        h1_ref[...] = h1.reshape(1, H, W, Pp).astype(jnp.bfloat16)    # bf16 store
    return kernel


# ----------------------- stage 2: bn1 + 3x3 conv (per-tap matmuls) ----------
def _make_stage2_kernel(H, W, Ho, Wo, stride):
    Hp, Wp = H + 2, W + 2
    if stride == 1:
        row_off = (0, 1, 2)
        col_off = (0, 1, 2)
    else:  # stride == 2: padded buffer is stored phase-major along H and W
        row_off = (0, Hp // 2, 1)
        col_off = (0, Wp // 2, 1)

    def kernel(h1_ref, s1_ref, t1_ref, w2_ref, h2_ref, st2_ref, pad_ref):
        Pp = h1_ref.shape[-1]
        h1 = jnp.maximum(h1_ref[0].astype(jnp.float32) * s1_ref[...] + t1_ref[...], 0.0)
        h1b = h1.astype(jnp.bfloat16)                                  # (H,W,Pp)

        # Zero only the 1-pixel halo; the interior is fully rewritten below on
        # every grid step (no stale data even with "parallel" semantics).
        zrow = jnp.zeros((1, Wp, Pp), jnp.bfloat16)
        zcol = jnp.zeros((Hp, 1, Pp), jnp.bfloat16)
        pad_ref[0:1, :, :] = zrow
        pad_ref[Hp - 1:Hp, :, :] = zrow
        pad_ref[:, 0:1, :] = zcol
        pad_ref[:, Wp - 1:Wp, :] = zcol

        if stride == 1:
            pad_ref[1:H + 1, 1:W + 1, :] = h1b
        else:
            H2, W2 = H // 2, W // 2
            Hp2, Wp2 = Hp // 2, Wp // 2
            # Padding shifts parity by one, so original even rows/cols land in
            # the odd-phase half of the phase-major padded buffer.
            pad_ref[Hp2:Hp2 + H2, Wp2:Wp2 + W2, :] = h1b[0:H2, 0:W2, :]
            pad_ref[Hp2:Hp2 + H2, 1:1 + W2, :] = h1b[0:H2, W2:W, :]
            pad_ref[1:1 + H2, Wp2:Wp2 + W2, :] = h1b[H2:H, 0:W2, :]
            pad_ref[1:1 + H2, 1:1 + W2, :] = h1b[H2:H, W2:W, :]

        # 9 per-tap matmuls accumulated in f32 (no im2col buffer): each tap is
        # a contiguous bf16 slice of the padded buffer (stride already applied
        # via the phase-major layout).
        acc = jnp.zeros((Ho * Wo, Pp), jnp.float32)
        t = 0
        for ky in range(3):
            rs = row_off[ky]
            for kx in range(3):
                cs = col_off[kx]
                patch = pad_ref[rs:rs + Ho, cs:cs + Wo, :].reshape(Ho * Wo, Pp)
                acc = acc + jnp.dot(patch, w2_ref[t],
                                    preferred_element_type=jnp.float32)
                t += 1

        _write_stats(st2_ref, acc)                                     # f32 stats
        h2_ref[...] = acc.reshape(1, Ho, Wo, Pp).astype(jnp.bfloat16)
    return kernel


# ------------------- stage 3: bn2 + conv3 + shortcut add --------------------
def _make_stage3_kernel(Ho, Wo, has_proj):
    def kernel(*refs):
        if has_proj:
            h2_ref, s2_ref, t2_ref, w3_ref, sc_ref, ssc_ref, tsc_ref, out_ref = refs
        else:
            h2_ref, s2_ref, t2_ref, w3_ref, x_ref, out_ref = refs
        Pp = h2_ref.shape[-1]
        Cop = w3_ref.shape[-1]

        h2 = jnp.maximum(h2_ref[0].astype(jnp.float32) * s2_ref[...] + t2_ref[...], 0.0)
        out = jnp.dot(h2.reshape(Ho * Wo, Pp).astype(jnp.bfloat16), w3_ref[...],
                      preferred_element_type=jnp.float32)
        out = out.reshape(Ho, Wo, Cop)

        if has_proj:
            sc = sc_ref[0].astype(jnp.float32) * ssc_ref[...] + tsc_ref[...]
        else:
            sc = x_ref[0]          # identity shortcut adds the ORIGINAL input x
        out_ref[...] = (out + sc).reshape(1, Ho, Wo, Cop)
    return kernel


# --------------------------------- wrapper ----------------------------------
def bottleneck_forward(x_nchw, params, stride):
    """x_nchw: (N, Cin, H, W) float32, like the PyTorch module input."""
    if stride not in (1, 2):
        raise NotImplementedError("only stride 1 or 2 (as used by ResNets)")

    x = jnp.transpose(x_nchw, (0, 2, 3, 1)).astype(jnp.float32)     # -> NHWC
    N, H, W, Cin = x.shape
    P = params["w1"].shape[-1]
    Cout = 4 * P
    has_proj = (stride != 1) or (Cin != Cout)
    Ho = (H - 1) // stride + 1
    Wo = (W - 1) // stride + 1
    if stride == 2:
        assert H % 2 == 0 and W % 2 == 0, "stride-2 block needs even H, W"
    # TODO(synk): W / Wo should be multiples of 8 for the in-kernel reshapes to
    #             be free; for ResNet 7x7/14x14 stages pad the spatial dims.

    Cp, Pp, Cop = _round_up(Cin), _round_up(P), _round_up(Cout)

    # Lane-dense, zero-padded parameters; matmul weights in bf16.
    w1 = _pad_to(params["w1"], (Cp, Pp)).astype(jnp.bfloat16)
    w2 = _pad_to(params["w2"], (3, 3, Pp, Pp)).astype(jnp.bfloat16).reshape(9, Pp, Pp)
    w3 = _pad_to(params["w3"], (Pp, Cop)).astype(jnp.bfloat16)
    g0 = _pad_to(params["g0"], (Cp,)); b0 = _pad_to(params["b0"], (Cp,))
    g1 = _pad_to(params["g1"], (Pp,)); b1 = _pad_to(params["b1"], (Pp,))
    g2 = _pad_to(params["g2"], (Pp,)); b2 = _pad_to(params["b2"], (Pp,))
    if has_proj:
        wsc = _pad_to(params["wsc"], (Cp, Cop)).astype(jnp.bfloat16)
        gsc = _pad_to(params["gsc"], (Cop,)); bsc = _pad_to(params["bsc"], (Cop,))

    xp = _pad_to(x, (N, H, W, Cp))
    if stride == 2:
        # Phase-major permutation of H and W: every strided access inside the
        # kernels becomes a contiguous slice.
        xp = jnp.concatenate([xp[:, 0::2], xp[:, 1::2]], axis=1)
        xp = jnp.concatenate([xp[:, :, 0::2], xp[:, :, 1::2]], axis=2)

    # bn0 needs a pass over x before stage 1 can run (train-mode BN).
    s0, t0 = _bn_scale_shift(xp, g0, b0)

    # ---- VMEM budget derived from block sizes, capped for v7x (64 MiB/TC) ----
    bx, bh1 = H * W * Cp * 4, H * W * Pp * 2
    bscb, bh2, bout = Ho * Wo * Cop * 2, Ho * Wo * Pp * 2, Ho * Wo * Cop * 4
    bw1, bwsc, bw2, bw3 = Cp * Pp * 2, Cp * Cop * 2, 9 * Pp * Pp * 2, Pp * Cop * 2
    bpad = (H + 2) * (W + 2) * Pp * 2
    need1 = 2 * (bx + bw1 + (bwsc if has_proj else 0) + bh1 + (bscb if has_proj else 0))
    need2 = 2 * (bh1 + bw2 + bh2) + bpad
    need3 = 2 * (bh2 + bw3 + (bscb if has_proj else bx) + bout)
    vmem_limit = max(16 << 20,
                     min(40 << 20, int(1.5 * max(need1, need2, need3)) + (4 << 20)))
    cparams = pltpu.CompilerParams(
        dimension_semantics=("parallel",),            # megacore-shard over batch
        vmem_limit_bytes=vmem_limit)

    vec = lambda c: pl.BlockSpec((1, c), lambda n: (0, 0))
    stat_spec = lambda c: pl.BlockSpec((1, STAT_ROWS, c), lambda n: (n, 0, 0))

    if not has_proj:
        mode = "identity"
    elif stride == 1:
        mode = "proj_fused"
    else:
        mode = "proj_split"

    # ------------------------------- stage 1 --------------------------------
    in1 = [xp, s0, t0]
    in1_specs = [pl.BlockSpec((1, H, W, Cp), lambda n: (n, 0, 0, 0)), vec(Cp), vec(Cp)]
    if mode == "proj_fused":
        w1sc = jnp.concatenate([w1, wsc], axis=1)     # one fused MXU pass over pre
        in1.append(w1sc)
        in1_specs.append(pl.BlockSpec((Cp, Pp + Cop), lambda n: (0, 0)))
    else:
        in1.append(w1)
        in1_specs.append(pl.BlockSpec((Cp, Pp), lambda n: (0, 0)))
        if mode == "proj_split":
            in1.append(wsc)
            in1_specs.append(pl.BlockSpec((Cp, Cop), lambda n: (0, 0)))

    out1_specs = [pl.BlockSpec((1, H, W, Pp), lambda n: (n, 0, 0, 0))]
    out1_shape = [jax.ShapeDtypeStruct((N, H, W, Pp), jnp.bfloat16)]
    if has_proj:
        out1_specs.append(pl.BlockSpec((1, Ho, Wo, Cop), lambda n: (n, 0, 0, 0)))
        out1_shape.append(jax.ShapeDtypeStruct((N, Ho, Wo, Cop), jnp.bfloat16))
    out1_specs.append(stat_spec(Pp))
    out1_shape.append(jax.ShapeDtypeStruct((N, STAT_ROWS, Pp), jnp.float32))
    if has_proj:
        out1_specs.append(stat_spec(Cop))
        out1_shape.append(jax.ShapeDtypeStruct((N, STAT_ROWS, Cop), jnp.float32))

    flops1 = 2 * N * H * W * Cp * Pp + (2 * N * Ho * Wo * Cp * Cop if has_proj else 0)
    bytes1 = N * (bx + bh1 + (bscb if has_proj else 0)) + bw1 + (bwsc if has_proj else 0)
    res1 = pl.pallas_call(
        _make_stage1_kernel(H, W, Ho, Wo, mode),
        grid=(N,),
        in_specs=in1_specs,
        out_specs=tuple(out1_specs),
        out_shape=tuple(out1_shape),
        compiler_params=cparams,
        cost_estimate=pl.CostEstimate(flops=int(flops1), transcendentals=0,
                                      bytes_accessed=int(bytes1)),
    )(*in1)
    if has_proj:
        h1_lin, sc_lin, st1, stsc = res1
    else:
        h1_lin, st1 = res1
        sc_lin = None

    # ------------------------------- stage 2 --------------------------------
    s1, t1 = _partials_to_scale_shift(st1, N * H * W, g1, b1)
    flops2 = 2 * N * Ho * Wo * 9 * Pp * Pp
    bytes2 = N * (bh1 + bh2) + bw2
    h2_lin, st2 = pl.pallas_call(
        _make_stage2_kernel(H, W, Ho, Wo, stride),
        grid=(N,),
        in_specs=[
            pl.BlockSpec((1, H, W, Pp), lambda n: (n, 0, 0, 0)),
            vec(Pp), vec(Pp),
            pl.BlockSpec((9, Pp, Pp), lambda n: (0, 0, 0)),
        ],
        out_specs=(pl.BlockSpec((1, Ho, Wo, Pp), lambda n: (n, 0, 0, 0)),
                   stat_spec(Pp)),
        out_shape=(jax.ShapeDtypeStruct((N, Ho, Wo, Pp), jnp.bfloat16),
                   jax.ShapeDtypeStruct((N, STAT_ROWS, Pp), jnp.float32)),
        scratch_shapes=[pltpu.VMEM((H + 2, W + 2, Pp), jnp.bfloat16)],  # padded h1
        compiler_params=cparams,
        cost_estimate=pl.CostEstimate(flops=int(flops2), transcendentals=0,
                                      bytes_accessed=int(bytes2)),
    )(h1_lin, s1, t1, w2)

    # ------------------------------- stage 3 --------------------------------
    s2, t2 = _partials_to_scale_shift(st2, N * Ho * Wo, g2, b2)
    in3 = [h2_lin, s2, t2, w3]
    in3_specs = [
        pl.BlockSpec((1, Ho, Wo, Pp), lambda n: (n, 0, 0, 0)),
        vec(Pp), vec(Pp),
        pl.BlockSpec((Pp, Cop), lambda n: (0, 0)),
    ]
    if has_proj:
        ssc, tsc = _partials_to_scale_shift(stsc, N * Ho * Wo, gsc, bsc)
        in3 += [sc_lin, ssc, tsc]
        in3_specs += [pl.BlockSpec((1, Ho, Wo, Cop), lambda n: (n, 0, 0, 0)),
                      vec(Cop), vec(Cop)]
    else:
        in3.append(xp)
        in3_specs.append(pl.BlockSpec((1, H, W, Cp), lambda n: (n, 0, 0, 0)))

    flops3 = 2 * N * Ho * Wo * Pp * Cop
    bytes3 = N * (bh2 + (bscb if has_proj else bx) + bout) + bw3
    out_p = pl.pallas_call(
        _make_stage3_kernel(Ho, Wo, has_proj),
        grid=(N,),
        in_specs=in3_specs,
        out_specs=pl.BlockSpec((1, Ho, Wo, Cop), lambda n: (n, 0, 0, 0)),
        out_shape=jax.ShapeDtypeStruct((N, Ho, Wo, Cop), jnp.float32),
        compiler_params=cparams,
        cost_estimate=pl.CostEstimate(flops=int(flops3), transcendentals=0,
                                      bytes_accessed=int(bytes3)),
    )(*in3)

    out = out_p[..., :Cout]                        # drop lane padding
    return jnp.transpose(out, (0, 3, 1, 2))        # back to NCHW


# ---------------- pure-JAX reference (for correctness check) ----------------
def ref_forward(x_nchw, params, stride):
    x = jnp.transpose(x_nchw, (0, 2, 3, 1)).astype(jnp.float32)
    Cin = x.shape[-1]
    P = params["w1"].shape[-1]
    has_proj = (stride != 1) or (Cin != 4 * P)

    def bn(v, g, b):
        mean = jnp.mean(v, axis=(0, 1, 2), keepdims=True)
        var = jnp.mean(jnp.square(v - mean), axis=(0, 1, 2), keepdims=True)
        return ((v - mean) * lax.rsqrt(var + EPS) * g.reshape(1, 1, 1, -1)
                + b.reshape(1, 1, 1, -1))

    dn = ("NHWC", "HWIO", "NHWC")

    def conv(v, w, s, pad):
        return lax.conv_general_dilated(v, w, (s, s), pad, dimension_numbers=dn)

    pre = jax.nn.relu(bn(x, params["g0"], params["b0"]))
    out = jax.nn.relu(bn(conv(pre, params["w1"][None, None], 1, "VALID"),
                         params["g1"], params["b1"]))
    out = jax.nn.relu(bn(conv(out, params["w2"], stride, ((1, 1), (1, 1))),
                         params["g2"], params["b2"]))
    out = conv(out, params["w3"][None, None], 1, "VALID")
    if has_proj:
        sc = bn(conv(pre, params["wsc"][None, None], stride, "VALID"),
                params["gsc"], params["bsc"])
    else:
        sc = x
    return jnp.transpose(out + sc, (0, 3, 1, 2))


# -------------------------- deterministic params ----------------------------
def init_params(key, in_planes, planes):
    cout = 4 * planes
    k = jax.random.split(key, 12)

    def n(kk, shape, scale=1.0):
        return scale * jax.random.normal(kk, shape, jnp.float32)

    return {
        "g0": 1.0 + 0.1 * n(k[0], (in_planes,)),
        "b0": 0.1 * n(k[1], (in_planes,)),
        "w1": n(k[2], (in_planes, planes), 1.0 / (in_planes ** 0.5)),
        "g1": 1.0 + 0.1 * n(k[3], (planes,)),
        "b1": 0.1 * n(k[4], (planes,)),
        "w2": n(k[5], (3, 3, planes, planes), 1.0 / ((9 * planes) ** 0.5)),
        "g2": 1.0 + 0.1 * n(k[6], (planes,)),
        "b2": 0.1 * n(k[7], (planes,)),
        "w3": n(k[8], (planes, cout), 1.0 / (planes ** 0.5)),
        "wsc": n(k[9], (in_planes, cout), 1.0 / (in_planes ** 0.5)),
        "gsc": 1.0 + 0.1 * n(k[10], (cout,)),
        "bsc": 0.1 * n(k[11], (cout,)),
    }


if __name__ == "__main__":
    key = jax.random.PRNGKey(0)
    N, H, W = 2, 16, 16
    configs = [
        # (name, in_planes, planes, stride)
        ("identity_shortcut", 16, 4, 1),     # 4*planes == in_planes, stride 1
        ("projection_stride1", 8, 4, 1),     # conv+BN shortcut, stride 1
        ("projection_stride2", 8, 4, 2),     # conv+BN shortcut, stride 2
    ]
    for name, in_planes, planes, stride in configs:
        key, kx_, kp_ = jax.random.split(key, 3)
        x = jax.random.normal(kx_, (N, in_planes, H, W), jnp.float32)  # NCHW
        params = init_params(kp_, in_planes, planes)

        out = jax.block_until_ready(bottleneck_forward(x, params, stride))
        ref = jax.block_until_ready(ref_forward(x, params, stride))

        assert out.shape == ref.shape, (name, out.shape, ref.shape)
        max_err = float(jnp.max(jnp.abs(out - ref)))
        # bf16 MXU operands + bf16 inter-stage intermediates (reference is f32):
        # tolerance is accordingly looser than pure-f32 numerics.
        assert jnp.allclose(out, ref, atol=5e-2, rtol=5e-2), (name, max_err)

    print("KERNEL_OK")
</pallas_src>

<mosaic_0001>
module attributes {stable_mosaic.version = 11 : i64} {
  func.func @kernel(%arg0: i32, %arg1: memref<1x16x16x128xf32, #tpu.memory_space<vmem>>, %arg2: memref<1x128xf32, #tpu.memory_space<vmem>>, %arg3: memref<1x128xf32, #tpu.memory_space<vmem>>, %arg4: memref<128x128xbf16, #tpu.memory_space<vmem>>, %arg5: memref<1x16x16x128xbf16, #tpu.memory_space<vmem>>, %arg6: memref<1x8x128xf32, #tpu.memory_space<vmem>>) attributes {dimension_semantics = [#tpu.dimension_semantics<parallel>], iteration_bounds = array<i64: 2>, scalar_prefetch = 0 : i64, scratch_operands = 0 : i64, tpu.core_type = #tpu.core_type<tc>, window_params = [{transform_indices = @transform_0, window_bounds = array<i64: 1, 16, 16, 128>}, {pipeline_mode = #tpu.pipeline_mode<synchronous>, transform_indices = @transform_1, window_bounds = array<i64: 1, 128>}, {pipeline_mode = #tpu.pipeline_mode<synchronous>, transform_indices = @transform_2, window_bounds = array<i64: 1, 128>}, {pipeline_mode = #tpu.pipeline_mode<synchronous>, transform_indices = @transform_3, window_bounds = array<i64: 128, 128>}, {transform_indices = @transform_4, window_bounds = array<i64: 1, 16, 16, 128>}, {transform_indices = @transform_5, window_bounds = array<i64: 1, 8, 128>}]} {
    %c0 = arith.constant 0 : index
    %c0_0 = arith.constant 0 : index
    %c0_1 = arith.constant 0 : index
    %c0_2 = arith.constant 0 : index
    %0 = vector.load %arg1[%c0, %c0_0, %c0_1, %c0_2] : memref<1x16x16x128xf32, #tpu.memory_space<vmem>>, vector<1x16x16x128xf32>
    %1 = vector.shape_cast %0 : vector<1x16x16x128xf32> to vector<16x16x128xf32>
    %c0_3 = arith.constant 0 : index
    %c0_4 = arith.constant 0 : index
    %2 = vector.load %arg2[%c0_3, %c0_4] : memref<1x128xf32, #tpu.memory_space<vmem>>, vector<1x128xf32>
    %3 = vector.shape_cast %2 : vector<1x128xf32> to vector<1x1x128xf32>
    %4 = vector.broadcast %3 : vector<1x1x128xf32> to vector<16x16x128xf32>
    %5 = arith.mulf %1, %4 : vector<16x16x128xf32>
    %c0_5 = arith.constant 0 : index
    %c0_6 = arith.constant 0 : index
    %6 = vector.load %arg3[%c0_5, %c0_6] : memref<1x128xf32, #tpu.memory_space<vmem>>, vector<1x128xf32>
    %7 = vector.shape_cast %6 : vector<1x128xf32> to vector<1x1x128xf32>
    %8 = vector.broadcast %7 : vector<1x1x128xf32> to vector<16x16x128xf32>
    %9 = arith.addf %5, %8 : vector<16x16x128xf32>
    %cst = arith.constant 0.000000e+00 : f32
    %10 = vector.broadcast %cst : f32 to vector<16x16x128xf32>
    %11 = arith.maximumf %9, %10 : vector<16x16x128xf32>
    %12 = vector.shape_cast %11 : vector<16x16x128xf32> to vector<256x128xf32>
    %13 = arith.truncf %12 : vector<256x128xf32> to vector<256x128xbf16>
    %c0_7 = arith.constant 0 : index
    %c0_8 = arith.constant 0 : index
    %14 = vector.load %arg4[%c0_7, %c0_8] : memref<128x128xbf16, #tpu.memory_space<vmem>>, vector<128x128xbf16>
    %cst_9 = arith.constant dense<0.000000e+00> : vector<256x128xf32>
    %15 = tpu.matmul %13, %14, %cst_9 {dimension_numbers = #tpu.dot_dimension_numbers<[1], [0], [0], [1], [0, 0, 1, 1], [], []>} : vector<256x128xbf16>, vector<128x128xbf16>, vector<256x128xf32> -> vector<256x128xf32>
    %cst_10 = arith.constant dense<0.000000e+00> : vector<128xf32>
    %16 = vector.multi_reduction <add>, %15, %cst_10 [0] : vector<256x128xf32> to vector<128xf32>
    %17 = vector.shape_cast %16 : vector<128xf32> to vector<1x128xf32>
    %c0_11 = arith.constant 0 : index
    %c0_12 = arith.constant 0 : index
    %c0_13 = arith.constant 0 : index
    %18 = vector.load %arg6[%c0_11, %c0_12, %c0_13] : memref<1x8x128xf32, #tpu.memory_space<vmem>>, vector<1x1x128xf32>
    %19 = vector.shape_cast %18 : vector<1x1x128xf32> to vector<1x128xf32>
    %20 = vector.shape_cast %17 : vector<1x128xf32> to vector<1x1x128xf32>
    tpu.vector_store %arg6[%c0_11, %c0_12, %c0_13], %20 {strides = array<i32>} : memref<1x8x128xf32, #tpu.memory_space<vmem>>, vector<1x1x128xf32>,
    %21 = arith.mulf %15, %15 : vector<256x128xf32>
    %cst_14 = arith.constant dense<0.000000e+00> : vector<128xf32>
    %22 = vector.multi_reduction <add>, %21, %cst_14 [0] : vector<256x128xf32> to vector<128xf32>
    %23 = vector.shape_cast %22 : vector<128xf32> to vector<1x128xf32>
    %c0_15 = arith.constant 0 : index
    %c1 = arith.constant 1 : index
    %c0_16 = arith.constant 0 : index
    %24 = vector.load %arg6[%c0_15, %c1, %c0_16] : memref<1x8x128xf32, #tpu.memory_space<vmem>>, vector<1x1x128xf32>
    %25 = vector.shape_cast %24 : vector<1x1x128xf32> to vector<1x128xf32>
    %26 = vector.shape_cast %23 : vector<1x128xf32> to vector<1x1x128xf32>
    tpu.vector_store %arg6[%c0_15, %c1, %c0_16], %26 {strides = array<i32>} : memref<1x8x128xf32, #tpu.memory_space<vmem>>, vector<1x1x128xf32>,
    %cst_17 = arith.constant 0.000000e+00 : f32
    %27 = vector.broadcast %cst_17 : f32 to vector<6x128xf32>
    %c0_18 = arith.constant 0 : index
    %c2 = arith.constant 2 : index
    %c0_19 = arith.constant 0 : index
    %28 = vector.load %arg6[%c0_18, %c2, %c0_19] : memref<1x8x128xf32, #tpu.memory_space<vmem>>, vector<1x6x128xf32>
    %29 = vector.shape_cast %28 : vector<1x6x128xf32> to vector<6x128xf32>
    %30 = vector.shape_cast %27 : vector<6x128xf32> to vector<1x6x128xf32>
    tpu.vector_store %arg6[%c0_18, %c2, %c0_19], %30 {strides = array<i32>} : memref<1x8x128xf32, #tpu.memory_space<vmem>>, vector<1x6x128xf32>,
    %31 = vector.shape_cast %15 : vector<256x128xf32> to vector<1x16x16x128xf32>
    %32 = arith.truncf %31 : vector<1x16x16x128xf32> to vector<1x16x16x128xbf16>
    %c0_20 = arith.constant 0 : index
    %c0_21 = arith.constant 0 : index
    %c0_22 = arith.constant 0 : index
    %c0_23 = arith.constant 0 : index
    %33 = vector.load %arg5[%c0_20, %c0_21, %c0_22, %c0_23] : memref<1x16x16x128xbf16, #tpu.memory_space<vmem>>, vector<1x16x16x128xbf16>
    tpu.vector_store %arg5[%c0_20, %c0_21, %c0_22, %c0_23], %32 {strides = array<i32>} : memref<1x16x16x128xbf16, #tpu.memory_space<vmem>>, vector<1x16x16x128xbf16>,
    return
  }
  func.func @transform_0(%arg0: i32) -> (i32, i32, i32, i32) {
    %c0_i32 = arith.constant 0 : i32
    %c0_i32_0 = arith.constant 0 : i32
    %c0_i32_1 = arith.constant 0 : i32
    %c0_i32_2 = arith.constant 0 : i32
    return %arg0, %c0_i32, %c0_i32_0, %c0_i32_1 : i32, i32, i32, i32
  }
  func.func @transform_1(%arg0: i32) -> (i32, i32) {
    %c0_i32 = arith.constant 0 : i32
    %c0_i32_0 = arith.constant 0 : i32
    %c0_i32_1 = arith.constant 0 : i32
    return %c0_i32, %c0_i32_0 : i32, i32
  }
  func.func @transform_2(%arg0: i32) -> (i32, i32) {
    %c0_i32 = arith.constant 0 : i32
    %c0_i32_0 = arith.constant 0 : i32
    %c0_i32_1 = arith.constant 0 : i32
    return %c0_i32, %c0_i32_0 : i32, i32
  }
  func.func @transform_3(%arg0: i32) -> (i32, i32) {
    %c0_i32 = arith.constant 0 : i32
    %c0_i32_0 = arith.constant 0 : i32
    %c0_i32_1 = arith.constant 0 : i32
    return %c0_i32, %c0_i32_0 : i32, i32
  }
  func.func @transform_4(%arg0: i32) -> (i32, i32, i32, i32) {
    %c0_i32 = arith.constant 0 : i32
    %c0_i32_0 = arith.constant 0 : i32
    %c0_i32_1 = arith.constant 0 : i32
    %c0_i32_2 = arith.constant 0 : i32
    return %arg0, %c0_i32, %c0_i32_0, %c0_i32_1 : i32, i32, i32, i32
  }
  func.func @transform_5(%arg0: i32) -> (i32, i32, i32) {
    %c0_i32 = arith.constant 0 : i32
    %c0_i32_0 = arith.constant 0 : i32
    %c0_i32_1 = arith.constant 0 : i32
    return %arg0, %c0_i32, %c0_i32_0 : i32, i32, i32
  }
}

</mosaic_0001>

<bundles_post_ra>
// kernel: tpu_custom_call.1
= control target key start
LH: loop header
LB: loop body
LE: loop exit
PB: predicated region body
PF: predicated region fallthrough
CT: control target
= control target key end

     0   :  { %11 = vsyncpa [#allocation3], 0  ;;  %s2109_s0 = inlined_call_operand.hbm [shape: f32[2,16,16,128], index: 0, kind: input, shape index: {}]   ;;  %s2110_s1 = inlined_call_operand.vmem [shape: f32[1,128], index: 1, kind: input, shape index: {}]   ;;  %s2111_s2 = inlined_call_operand.vmem [shape: f32[1,128], index: 2, kind: input, shape index: {}]   ;;  %s2112_s3 = inlined_call_operand.hbm [shape: bf16[128,128], index: 3, kind: input, shape index: {}]   ;;  %s2113_s4 = inlined_call_operand.hbm [shape: bf16[2,16,16,128], index: 4, kind: output, shape index: {0}]   ;;  %s2114_s5 = inlined_call_operand.hbm [shape: f32[2,8,128], index: 5, kind: output, shape index: {1}]  }
   0x1   :  { %13 = vsyncpa [#allocation3 + $0x1], 0 }
   0x2   :  { %14 = vsyncpa [#allocation6], 0 }
   0x3   :  { %15 = vsyncpa [#allocation4], 0 }
   0x4   :  { %17 = vsyncpa [#allocation4 + $0x1], 0 }
   0x5   :  { %18 = vsyncpa [#allocation9], 0 }
   0x6   :  { %20 = vsyncpa [#allocation9 + $0x1], 0  ;;  %s1627_s18 = smov 0   ;;  %s1629_s19 = smov 0  }
   0x7   :  { %s1631_s20 = smov 0   ;;  %s1633_s21 = smov 0  }
   0x8 LB: > { %s1648_s22 = sadd.s32 4294967295, %s1584_s21   ;;  %s1069_s23 = sadd.s32 4294967294, %s1584_s21   ;;  %s1584_s21 = sphi %s1633_s21, %s2134_s21   ;;  %s1580_s20 = sphi %s1631_s20, %s2133_s20   ;;  %s1576_s19 = sphi %s1629_s19, %s2132_s19   ;;  %s1572_s18 = sphi %s1627_s18, %s2131_s18  }
   0x9   : > { %p46_p0 = scmp.ne.s32.totalorder %s1576_s19, %s1572_s18  ;;  %p2115_p1 = scmp.eq.s32.totalorder %s1648_s22, 0 }
   0xa   : > { %p139_p3 = scmp.eq.s32.totalorder %s1069_s23, 1  ;;  %p1070_p5 = scmp.ge.s32.totalorder %s1584_s21, 1 }
   0xb   : > { %p1657_p4 = por %p2115_p1, %p46_p0  ;;  %p172_p7 = scmp.lt.s32.totalorder %s1584_s21, 3 }
   0xc   : > { %p1662_p6 = por %p139_p3, %p46_p0  ;;  %s1586_s27 = smov [#allocation5]  }
   0xd   : > { %s2118_s24 = scalar_select %p1657_p4, 1, 0 }
   0xe   : > { %s2119_s25 = scalar_select %p1662_p6, 1, 0 }
   0xf   : > { %p1667_p8 = pnand %p1070_p5, %p172_p7  ;;  %s190_s28 = sshll.u32 %s1586_s27, 4  ;;  %s1671_s28 = int_to_ptr.vmem [resolvable:$true] %s190_s28 }
  0x10   : > { %s1683_s30 = sadd.s32 1, %s1584_s21   ;;  %s33_s6 = sadd.s32 1, %s1580_s20 }
  0x11   : > { %s2120_s26 = scalar_select %p1667_p8, 1, 0 }
  0x12   : > { %p1357_p9 = pneg %p1667_p8  ;;  %s30_s7 = ssub.s32 %s1584_s21, %s1683_s30 }
  0x13   : > { %s1424_s10 = scalar_lea.hbm %s2112_s3, 1024 }
  0x14   : > { %p1678_p11 = pnand %p1357_p9, %p2115_p1  ;;  %p1425_p12 = scmp.ne.s32.totalorder %s2112_s3, %s1424_s10 }
  0x15   : > { %p1431_p5 = scmp.lt.u32.totalorder %s1424_s10, %s2112_s3 }
  0x16   : > { %p1426_p13 = pneg %p1678_p11 }
  0x18   : > { %p1427_p0 = pnand %p1426_p13, %p1425_p12 }
  0x1a   : > { %p1428_p3 = pneg %p1427_p0 }
  0x1c   : > { %p1433_p7 = pnand %p1431_p5, %p1428_p3 }
  0x1e   : > { %1436 = shalt.err (!%p1433_p7)
}
  0x1f   : > { %s1437_s15 = scalar_lea.vmem %s1671_s28, 1024  ;;  %p1445_p2 = scmp.lt.s32.totalorder %s1671_s28, %s1671_s28 }
  0x20   : > { %p1438_p9 = scmp.ne.s32.totalorder %s1671_s28, %s1437_s15  ;;  %p1446_p6 = scmp.lt.s32.totalorder %s1437_s15, %s1437_s15 }
  0x22   : > { %p1440_p10 = pnand %p1438_p9, %p1426_p13  ;;  %p1447_p4 = por %p1446_p6, %p1445_p2 }
  0x24   : > { %p1441_p1 = pneg %p1440_p10 }
  0x26   : > { %p1448_p8 = pnand %p1447_p4, %p1441_p1 }
  0x28   : > { %1451 = shalt.err (!%p1448_p8)
}
  0x29   : > { %s1587_s16 = smov 64   ;;  %s1588_s17 = smov 4  }
  0x2a   : > { %1360 = dma.hbm_to_vmem [thread:$0]  (!%p1678_p11), %s2112_s3, 1024, %s1671_s28, [#allocation6], %s1587_s16, %s1587_s16, %s1588_s17  }
  0x2b   : > { %p31_p2 = scmp.eq.s32.totalorder %s30_s7, 0  ;;  %p40_p1 = scmp.ne.s32.totalorder %s1580_s20, %s1576_s19 }
  0x2c   : > { %p41_p4 = scmp.eq.s32.totalorder %s1584_s21, 0  ;;  %p1373_p6 = scmp.lt.s32.totalorder %s1584_s21, 2 }
  0x2d   : > { %s1714_s8 = scalar_select %p31_p2, %s1580_s20, %s33_s6  }
  0x2e   : > { %p42_p8 = por %p41_p4, %p40_p1  ;;  %p2122_p10 = scmp.eq.s32.totalorder %s1648_s22, 1 }
  0x2f   : > { %s204_s10 = sand.u32 1, %s1580_s20   ;;  %s1130_s11 = sshll.u32 %s1584_s21, 12 }
  0x30   : > { %p1718_p12 = por %p2122_p10, %p40_p1  ;;  %s1073_s12 = sshll.u32 %s204_s10, 8 }
  0x31   : > { %s1727_s14 = scalar_lea.hbm %s2109_s0, %s1130_s11  ;;  %s208_s28 = scalar_lea.vmem [#allocation2], %s1073_s12 }
  0x32   : > { %s215_s6 = sshll.u32 %s208_s28, 4  ;;  %p1729_p11 = pnand %p1373_p6, %p42_p8  ;;  %s1733_s6 = int_to_ptr.vmem [resolvable:$true] %s215_s6 }
  0x33   : > { %s1735_s15 = scalar_lea.sflag [#allocation3], %s204_s10  ;;  %s1452_s16 = scalar_lea.hbm %s1727_s14, 4096 }
  0x34   : > { %p1453_p13 = scmp.ne.s32.totalorder %s1727_s14, %s1452_s16  ;;  %p1454_p0 = pneg %p1729_p11 }
  0x35   : > { %s1457_s27 = scalar_lea.hbm %s2109_s0, 8192  ;;  %p1458_p7 = scmp.lt.u32.totalorder %s1727_s14, %s2109_s0 }
  0x36   : > { %p1455_p3 = pnand %p1454_p0, %p1453_p13  ;;  %p1459_p9 = scmp.lt.u32.totalorder %s1457_s27, %s1452_s16 }
  0x37   : > { %p1461_p1 = scmp.lt.u32.totalorder %s1452_s16, %s1727_s14 }
  0x38   : > { %p1456_p5 = pneg %p1455_p3  ;;  %p1460_p2 = por %p1459_p9, %p1458_p7 }
  0x3a   : > { %p1462_p4 = por %p1461_p1, %p1460_p2 }
  0x3c   : > { %p1463_p6 = pnand %p1462_p4, %p1456_p5 }
  0x3e   : > { %1466 = shalt.err (!%p1463_p6)
}
  0x3f   : > { %s1467_s10 = scalar_lea.vmem %s1733_s6, 4096  ;;  %s1589_s29 = smov [#allocation2]  }
  0x40   : > { %p1468_p8 = scmp.ne.s32.totalorder %s1733_s6, %s1467_s10  ;;  %s1472_s13 = sshll.u32 %s1589_s29, 4  ;;  %s1473_s13 = int_to_ptr.vmem [resolvable:$false] %s1472_s13 }
  0x41   : > { %s1474_s28 = scalar_lea.vmem %s1473_s13, 8192  ;;  %p1475_p3 = scmp.lt.s32.totalorder %s1733_s6, %s1473_s13 }
  0x42   : > { %p1470_p10 = pnand %p1468_p8, %p1454_p0  ;;  %p1476_p7 = scmp.lt.s32.totalorder %s1474_s28, %s1467_s10 }
  0x44   : > { %p1471_p13 = pneg %p1470_p10  ;;  %p1477_p9 = por %p1476_p7, %p1475_p3 }
  0x46   : > { %p1478_p2 = pnand %p1477_p9, %p1471_p13 }
  0x48   : > { %1481 = shalt.err (!%p1478_p2)
}
  0x49   : > { %s1590_s16 = smov 128   ;;  %s1591_s17 = smov 8  }
  0x4a   : > { %1364 = dma.hbm_to_vmem [thread:$0]  (!%p1729_p11), %s1727_s14, 4096, %s1733_s6, %s1735_s15, %s1590_s16, %s1590_s16, %s1591_s17  }
  0x4b   : > { %p2125_p0 = scmp.ne.s32.totalorder %s2120_s26, 0 }
  0x4c   : > { %s1766_s23 = sand.u32 (!%p2125_p0), 1, %s1576_s19   ;;  %p2126_p5 = scmp.ne.s32.totalorder (!%p2125_p0), %s2118_s24, 0 }
  0x4d   : > { %227 = sbr.rel (%p2125_p0) target bundleno = 437 (0x1b5), region = 36  ;;  %s1077_s27 = sshll.u32 (!%p2125_p0), %s1766_s23, 8 }
  0x4e   : > { %s230_s11 = scalar_lea.sflag (!%p2125_p0), [#allocation3], %s1766_s23  ;;  %s1770_s12 = scalar_lea.vmem (!%p2125_p0), [#allocation2], %s1077_s27 }
  0x54   : > { %1555 = dma.done.wait (%p2126_p5), %s230_s11, 4096  }
  0x55   : > { %1557 = vsyncadd (%p2126_p5), %s230_s11, 4294963200  ;;  %p2127_p11 = scmp.eq.s32.totalorder %s1648_s22, 0 }
  0x57   : > { %1559 = dma.done.wait (%p2127_p11), [#allocation6], 1024   ;;  %p2128_p1 = pmov %p2127_p11 }
  0x58   : > { %v1416_v0 = vld [vmem:[#allocation5] sm:$0xff]   ;;  %v1417_v1 = vld [vmem:[#allocation5 + $0x8] sm:$0xff]   ;;  %v1418_v2 = vld [vmem:[#allocation5 + $0x10] sm:$0xff]   ;;  %s1080_s7 = sshll.u32 %s1766_s23, 3  ;;  %s1079_s10 = sshll.u32 %s1766_s23, 7 }
  0x59   : > { %1561 = vsyncadd (%p2128_p1), [#allocation6], 4294966272  ;;  %1283 = vmatprep.subr.bf16.mxu0 %v1416_v0  ;;  %1331 = vmatprep.subr.bf16.mxu1 %v1416_v0  ;;  %v1419_v3 = vld [vmem:[#allocation5 + $0x18] sm:$0xff]   ;;  %v270_v4 = vld [vmem:[%s1770_s12] sm:$0xff]  ;;  %s1907_s15 = scalar_lea.vmem [#allocation8], %s1080_s7  ;;  %s1921_s29 = scalar_lea.vmem [#allocation7], %s1079_s10 }
  0x5a   : > { %1284 = vmatpush3.bf16.msra.mxu0 %v1416_v0  ;;  %1339 = vmatpush3.bf16.msra.mxu1 %v1416_v0  ;;  %v271_v5 = vld [vmem:[%s1770_s12 + $0x8] sm:$0xff]  ;;  %v1785_v6 = vld [vmem:[%s2110_s1] ss:$0 sm:$0xff]  ;;  %v272_v10 = vld [vmem:[%s1770_s12 + $0x10] sm:$0xff]  ;;  %s1163_s13 = sshll.u32 %s1648_s22, 11  ;;  %s941_s28 = sshll.u32 %s1921_s29, 4  ;;  %s1978_s28 = int_to_ptr.vmem [resolvable:$true] %s941_s28 }
  0x5b   : > { %1285 = vmatprep.subr.bf16.mxu0 %v1417_v1  ;;  %1332 = vmatprep.subr.bf16.mxu1 %v1417_v1  ;;  %v309_v7 = vmul.f32 %v1785_v6, %v270_v4  ;;  %v310_v8 = vmul.f32 %v1785_v6, %v271_v5  ;;  %v1792_v9 = vld [vmem:[%s2111_s2] ss:$0 sm:$0xff]  ;;  %v273_v11 = vld [vmem:[%s1770_s12 + $0x18] sm:$0xff]  ;;  %v311_v12 = vmul.f32 %v1785_v6, %v272_v10  ;;  %v275_v20 = vld [vmem:[%s1770_s12 + $0x28] sm:$0xff]  ;;  %s1976_s27 = scalar_lea.hbm %s2113_s4, %s1163_s13  ;;  %s923_s11 = scalar_lea.sflag [#allocation4], %s1766_s23 }
  0x5c   : > { %v312_v15 = vmul.f32 %v1785_v6, %v273_v11  ;;  %v274_v16 = vld [vmem:[%s1770_s12 + $0x20] sm:$0xff]  ;;  %v276_v22 = vld [vmem:[%s1770_s12 + $0x30] sm:$0xff]  ;;  %v277_v26 = vld [vmem:[%s1770_s12 + $0x38] sm:$0xff]  ;;  %v314_v28 = vmul.f32 %v1785_v6, %v275_v20  ;;  %s1593_s24 = smov [#allocation7]  }
  0x5d   : > { %v348_v13 = vadd.f32 %v1792_v9, %v309_v7  ;;  %v349_v14 = vadd.f32 %v1792_v9, %v310_v8  ;;  %v1420_v17 = vld [vmem:[#allocation5 + $0x20] sm:$0xff]   ;;  %v313_v21 = vmul.f32 %v1785_v6, %v274_v16  ;;  %v350_v24 = vadd.f32 %v1792_v9, %v311_v12  ;;  %v1421_v27 = vld [vmem:[#allocation5 + $0x28] sm:$0xff]   ;;  %v1422_v35 = vld [vmem:[#allocation5 + $0x30] sm:$0xff]   ;;  %s1486_s26 = sshll.u32 %s1593_s24, 4  ;;  %s1487_s26 = int_to_ptr.vmem [resolvable:$false] %s1486_s26 }
  0x5e   : > { %1286 = vmatpush3.bf16.msra.mxu0 %v1417_v1  ;;  %1340 = vmatpush3.bf16.msra.mxu1 %v1417_v1  ;;  %v351_v25 = vadd.f32 %v1792_v9, %v312_v15  ;;  %v315_v29 = vmul.f32 %v1785_v6, %v276_v22  ;;  %v316_v30 = vmul.f32 %v1785_v6, %v277_v26  ;;  %v286_v31 = vld [vmem:[%s1770_s12 + $0x80] sm:$0xff]  ;;  %v287_v38 = vld [vmem:[%s1770_s12 + $0x88] sm:$0xff]  ;;  %v288_v42 = vld [vmem:[%s1770_s12 + $0x90] sm:$0xff]  ;;  %s1488_s14 = scalar_lea.vmem %s1487_s26, 4096  ;;  %p1489_p10 = scmp.lt.s32.totalorder %s1978_s28, %s1487_s26 }
  0x5f   : > { %1287 = vmatprep.subr.bf16.mxu0 %v1418_v2  ;;  %1333 = vmatprep.subr.bf16.mxu1 %v1418_v2  ;;  %v380_v18 = vmax.f32 %v348_v13, 0.0  ;;  %v381_v19 = vmax.f32 %v349_v14, 0.0  ;;  %v382_v32 = vmax.f32 %v350_v24, 0.0  ;;  %v1812_v34 = vadd.f32 %v1792_v9, %v313_v21  ;;  %v278_v37 = vld [vmem:[%s1770_s12 + $0x40] sm:$0xff]  ;;  %v279_v40 = vld [vmem:[%s1770_s12 + $0x48] sm:$0xff]  ;;  %v289_v44 = vld [vmem:[%s1770_s12 + $0x98] sm:$0xff] }
  0x60   : > { %v383_v33 = vmax.f32 %v351_v25, 0.0  ;;  %v1815_v36 = vadd.f32 %v1792_v9, %v314_v28  ;;  %v1820_v39 = vadd.f32 %v1792_v9, %v315_v29  ;;  %v325_v41 = vmul.f32 %v1785_v6, %v286_v31  ;;  %v290_v45 = vld [vmem:[%s1770_s12 + $0xa0] sm:$0xff]  ;;  %v291_v50 = vld [vmem:[%s1770_s12 + $0xa8] sm:$0xff]  ;;  %v292_v51 = vld [vmem:[%s1770_s12 + $0xb0] sm:$0xff] }
  0x61   : > { %v412_v23 = vpack.c.bf16 %v381_v19, %v380_v18  ;;  %v1826_v43 = vadd.f32 %v1792_v9, %v316_v30  ;;  %v384_v47 = vmax.f32 %v1812_v34, 0.0  ;;  %v317_v48 = vmul.f32 %v1785_v6, %v278_v37  ;;  %v1423_v52 = vld [vmem:[#allocation5 + $0x38] sm:$0xff]   ;;  %v295_v8 = vld [vmem:[%s1770_s12 + $0xc8] sm:$0xff]  ;;  %v280_v14 = vld [vmem:[%s1770_s12 + $0x50] sm:$0xff] }
  0x62   : > { %1288 = vmatpush3.bf16.msra.mxu0 %v1418_v2  ;;  %1341 = vmatpush3.bf16.msra.mxu1 %v1418_v2  ;;  %v1830_v46 = vpack.c.bf16 %v383_v33, %v382_v32  ;;  %v326_v49 = vmul.f32 %v1785_v6, %v287_v38  ;;  %v385_v53 = vmax.f32 %v1815_v36, 0.0  ;;  %v318_v54 = vmul.f32 %v1785_v6, %v279_v40  ;;  %v293_v61 = vld [vmem:[%s1770_s12 + $0xb8] sm:$0xff]  ;;  %v294_v2 = vld [vmem:[%s1770_s12 + $0xc0] sm:$0xff]  ;;  %v283_v21 = vld [vmem:[%s1770_s12 + $0x68] sm:$0xff] }
  0x63   : > { %1289 = vmatprep.subr.bf16.mxu0 %v1419_v3  ;;  %1334 = vmatprep.subr.bf16.mxu1 %v1419_v3  ;;  %v364_v55 = vadd.f32 %v1792_v9, %v325_v41  ;;  %v327_v56 = vmul.f32 %v1785_v6, %v288_v42  ;;  %v386_v57 = vmax.f32 %v1820_v39, 0.0  ;;  %v328_v59 = vmul.f32 %v1785_v6, %v289_v44  ;;  %v281_v15 = vld [vmem:[%s1770_s12 + $0x58] sm:$0xff]  ;;  %v282_v20 = vld [vmem:[%s1770_s12 + $0x60] sm:$0xff]  ;;  %v296_v30 = vld [vmem:[%s1770_s12 + $0xd0] sm:$0xff] }
  0x64   : > { %1299 = vmatprep.mubr.bf16.mxu0 %v412_v23  ;;  %v365_v58 = vadd.f32 %v1792_v9, %v326_v49  ;;  %v329_v60 = vmul.f32 %v1785_v6, %v290_v45  ;;  %v330_v0 = vmul.f32 %v1785_v6, %v291_v50  ;;  %v331_v1 = vmul.f32 %v1785_v6, %v292_v51  ;;  %v297_v31 = vld [vmem:[%s1770_s12 + $0xd8] sm:$0xff]  ;;  %v298_v36 = vld [vmem:[%s1770_s12 + $0xe0] sm:$0xff]  ;;  %v299_v37 = vld [vmem:[%s1770_s12 + $0xe8] sm:$0xff] }
  0x65   : > { %v396_v62 = vmax.f32 %v364_v55, 0.0  ;;  %v366_v63 = vadd.f32 %v1792_v9, %v327_v56  ;;  %v367_v5 = vadd.f32 %v1792_v9, %v328_v59  ;;  %v357_v10 = vadd.f32 %v1792_v9, %v318_v54  ;;  %v284_v56 = vld [vmem:[%s1770_s12 + $0x70] sm:$0xff] }
  0x66   : > { %1290 = vmatpush3.bf16.msra.mxu0 %v1419_v3  ;;  %1342 = vmatpush3.bf16.msra.mxu1 %v1419_v3  ;;  %v1851_v3 = vadd.f32 %v1792_v9, %v317_v48  ;;  %v397_v4 = vmax.f32 %v365_v58, 0.0  ;;  %v368_v7 = vadd.f32 %v1792_v9, %v329_v60  ;;  %v369_v12 = vadd.f32 %v1792_v9, %v330_v0  ;;  %v285_v58 = vld [vmem:[%s1770_s12 + $0x78] sm:$0xff]  ;;  %v300_v0 = vld [vmem:[%s1770_s12 + $0xf0] sm:$0xff] }
  0x67   : > { %1291 = vmatprep.subr.bf16.mxu0 %v1420_v17  ;;  %1335 = vmatprep.subr.bf16.mxu1 %v1420_v17  ;;  %v398_v11 = vmax.f32 %v366_v63, 0.0  ;;  %v332_v13 = vmul.f32 %v1785_v6, %v293_v61  ;;  %v333_v19 = vmul.f32 %v1785_v6, %v294_v2  ;;  %v370_v23 = vadd.f32 %v1792_v9, %v331_v1  ;;  %v301_v1 = vld [vmem:[%s1770_s12 + $0xf8] sm:$0xff]  ;;  %s1482_s12 = scalar_lea.vmem %s1978_s28, 2048 }
  0x68   : > { %v420_v16 = vpack.c.bf16 %v397_v4, %v396_v62  ;;  %v400_v18 = vmax.f32 %v368_v7, 0.0  ;;  %v401_v22 = vmax.f32 %v369_v12, 0.0  ;;  %v334_v25 = vmul.f32 %v1785_v6, %v295_v8  ;;  %p1483_p4 = scmp.ne.s32.totalorder %s1978_s28, %s1482_s12  ;;  %p1490_p13 = scmp.lt.s32.totalorder %s1488_s14, %s1482_s12 }
  0x69   : > { %v371_v24 = vadd.f32 %v1792_v9, %v332_v13  ;;  %v414_v26 = vpack.c.bf16 %v385_v53, %v384_v47  ;;  %v372_v29 = vadd.f32 %v1792_v9, %v333_v19  ;;  %v319_v32 = vmul.f32 %v1785_v6, %v280_v14 }
  0x6a   : > { %1292 = vmatpush3.bf16.msra.mxu0 %v1420_v17  ;;  %1343 = vmatpush3.bf16.msra.mxu1 %v1420_v17  ;;  %v399_v17 = vmax.f32 %v367_v5, 0.0  ;;  %v320_v33 = vmul.f32 %v1785_v6, %v281_v15  ;;  %v422_v34 = vpack.c.bf16 %v401_v22, %v400_v18  ;;  %v388_v38 = vmax.f32 %v1851_v3, 0.0  ;;  %p1484_p6 = pnand %p1483_p4, %p1718_p12  ;;  %p1491_p3 = por %p1490_p13, %p1489_p10 }
  0x6b   : > { %1293 = vmatprep.subr.bf16.mxu0 %v1421_v27  ;;  %1336 = vmatprep.subr.bf16.mxu1 %v1421_v27  ;;  %v389_v40 = vmax.f32 %v357_v10, 0.0  ;;  %v321_v41 = vmul.f32 %v1785_v6, %v282_v20  ;;  %v322_v42 = vmul.f32 %v1785_v6, %v283_v21  ;;  %v403_v44 = vmax.f32 %v371_v24, 0.0 }
  0x6c   : > { %v421_v28 = vpack.c.bf16 %v399_v17, %v398_v11  ;;  %1315 = vmatprep.mubr.bf16.mxu1 %v420_v16  ;;  %v335_v45 = vmul.f32 %v1785_v6, %v296_v30  ;;  %v336_v47 = vmul.f32 %v1785_v6, %v297_v31  ;;  %v404_v48 = vmax.f32 %v372_v29, 0.0  ;;  %p1485_p8 = pneg %p1484_p6 }
  0x6d   : > { %v337_v50 = vmul.f32 %v1785_v6, %v298_v36  ;;  %v338_v51 = vmul.f32 %v1785_v6, %v299_v37  ;;  %v359_v53 = vadd.f32 %v1792_v9, %v320_v33  ;;  %v360_v54 = vadd.f32 %v1792_v9, %v321_v41 }
  0x6e   : > { %1294 = vmatpush3.bf16.msra.mxu0 %v1421_v27  ;;  %1344 = vmatpush3.bf16.msra.mxu1 %v1421_v27  ;;  %v387_v27 = vmax.f32 %v1826_v43, 0.0  ;;  %v402_v43 = vmax.f32 %v370_v23, 0.0  ;;  %v361_v55 = vadd.f32 %v1792_v9, %v322_v42  ;;  %v374_v60 = vadd.f32 %v1792_v9, %v335_v45  ;;  %p1492_p7 = pnand %p1491_p3, %p1485_p8 }
  0x6f   : > { %1295 = vmatprep.subr.bf16.mxu0 %v1422_v35  ;;  %1337 = vmatprep.subr.bf16.mxu1 %v1422_v35  ;;  %v375_v61 = vadd.f32 %v1792_v9, %v336_v47  ;;  %v416_v62 = vpack.c.bf16 %v389_v40, %v388_v38  ;;  %v376_v39 = vadd.f32 %v1792_v9, %v337_v50  ;;  %v391_v3 = vmax.f32 %v359_v53, 0.0 }
  0x70   : > { %v423_v59 = vpack.c.bf16 %v403_v44, %v402_v43  ;;  %v323_v4 = vmul.f32 %v1785_v6, %v284_v56  ;;  %v324_v5 = vmul.f32 %v1785_v6, %v285_v58  ;;  %v406_v7 = vmax.f32 %v374_v60, 0.0 }
  0x71   : > { %v407_v8 = vmax.f32 %v375_v61, 0.0  ;;  %v339_v10 = vmul.f32 %v1785_v6, %v300_v0  ;;  %v340_v11 = vmul.f32 %v1785_v6, %v301_v1  ;;  %v392_v12 = vmax.f32 %v360_v54, 0.0 }
  0x72   : > { %1296 = vmatpush3.bf16.msra.mxu0 %v1422_v35  ;;  %1345 = vmatpush3.bf16.msra.mxu1 %v1422_v35  ;;  %v373_v35 = vadd.f32 %v1792_v9, %v334_v25  ;;  %v393_v13 = vmax.f32 %v361_v55, 0.0  ;;  %v408_v14 = vmax.f32 %v376_v39, 0.0  ;;  %v362_v17 = vadd.f32 %v1792_v9, %v323_v4 }
  0x73   : > { %1297 = vmatprep.subr.bf16.mxu0 %v1423_v52  ;;  %1338 = vmatprep.subr.bf16.mxu1 %v1423_v52  ;;  %v363_v18 = vadd.f32 %v1792_v9, %v324_v5  ;;  %v425_v19 = vpack.c.bf16 %v407_v8, %v406_v7  ;;  %v378_v20 = vadd.f32 %v1792_v9, %v339_v10 }
  0x74   : > { %v405_v49 = vmax.f32 %v373_v35, 0.0  ;;  %v379_v21 = vadd.f32 %v1792_v9, %v340_v11  ;;  %v418_v22 = vpack.c.bf16 %v393_v13, %v392_v12  ;;  %v394_v6 = vmax.f32 %v362_v17, 0.0 }
  0x75   : > { %v395_v24 = vmax.f32 %v363_v18, 0.0  ;;  %v410_v25 = vmax.f32 %v378_v20, 0.0 }
  0x76   : > { %1298 = vmatpush3.bf16.msra.mxu0 %v1423_v52  ;;  %1346 = vmatpush3.bf16.msra.mxu1 %v1423_v52  ;;  %v358_v52 = vadd.f32 %v1792_v9, %v319_v32  ;;  %v424_v63 = vpack.c.bf16 %v405_v49, %v404_v48 }
  0x78   : > { %v390_v2 = vmax.f32 %v358_v52, 0.0 }
  0x79   : > { %1300 = vmatmul.mubr.bf16.vlgmr.msra.gmra.mrb[0].mxu0 %v1830_v46  ;;  %1316 = vmatmul.mubr.bf16.vlgmr.msra.gmra.mrb[0].mxu1 %v421_v28  ;;  %v415_v46 = vpack.c.bf16 %v387_v27, %v386_v57  ;;  %v377_v57 = vadd.f32 %v1792_v9, %v338_v51  ;;  %v419_v27 = vpack.c.bf16 %v395_v24, %v394_v6  ;;  %v1592_v9 = vmov 0.0  }
  0x7a   : > { %1303 = vmatprep.mubr.bf16.mxu0 %v414_v26  ;;  %1319 = vmatprep.mubr.bf16.mxu1 %v422_v34  ;;  %v417_v16 = vpack.c.bf16 %v391_v3, %v390_v2  ;;  %v411_v26 = vmax.f32 %v379_v21, 0.0  ;;  %761 = vst [vmem:[%s1907_s15 + $0x2] sm:$0x3f] %v1592_v9 }
  0x7b   : > { %v409_v15 = vmax.f32 %v377_v57, 0.0 }
  0x7c   : > { %v427_v28 = vpack.c.bf16 %v411_v26, %v410_v25 }
  0x7d   : > { %v426_v23 = vpack.c.bf16 %v409_v15, %v408_v14 }
  0x81   : > { %1304 = vmatmul.mubr.bf16.gmra.mrb[4].mxu0 %v415_v46  ;;  %1320 = vmatmul.mubr.bf16.gmra.mrb[4].mxu1 %v423_v59 }
  0x82   : > { %1307 = vmatprep.mubr.bf16.mxu0 %v416_v62  ;;  %1323 = vmatprep.mubr.bf16.mxu1 %v424_v63 }
  0x89   : > { %1308 = vmatmul.mubr.bf16.gmra.mrb[8].mxu0 %v417_v16  ;;  %1324 = vmatmul.mubr.bf16.gmra.mrb[8].mxu1 %v425_v19 }
  0x8a   : > { %1311 = vmatprep.mubr.bf16.mxu0 %v418_v22  ;;  %1327 = vmatprep.mubr.bf16.mxu1 %v426_v23 }
  0x91   : > { %1312 = vmatmul.mubr.bf16.gmra.mrb[12].mxu0 %v419_v27  ;;  %1328 = vmatmul.mubr.bf16.gmra.mrb[12].mxu1 %v427_v28 }
 0x14c   : > { %v1301_v29 = vpop.f32.mrb[0].mxu0  ;;  %v1911_v30 = vpop.f32.mrb[0].mxu1 }
 0x14d   : > { %v526_v31 = vpop.f32.mrb[1].mxu0  ;;  %v1913_v32 = vpop.f32.mrb[1].mxu1  ;;  %v693_v45 = vmul.f32 %v1301_v29, %v1301_v29 }
 0x14e   : > { %v1302_v33 = vpop.f32.mrb[2].mxu0  ;;  %v1915_v34 = vpop.f32.mrb[2].mxu1  ;;  %v691_v40 = vmul.f32 %v526_v31, %v526_v31 }
 0x14f   : > { %v1172_v35 = vpack.c.bf16 %v1302_v33, %v1301_v29  ;;  %v529_v36 = vpop.f32.mrb[3].mxu0  ;;  %v1212_v37 = vpack.c.bf16 %v1915_v34, %v1911_v30  ;;  %v1919_v38 = vpop.f32.mrb[3].mxu1  ;;  %v694_v49 = vmul.f32 %v1302_v33, %v1302_v33 }
 0x150   : > { %v653_v41 = vadd.f32 %v529_v36, %v526_v31  ;;  %v692_v42 = vmul.f32 %v529_v36, %v529_v36  ;;  %v1167_v43 = vpack.c.bf16 %v529_v36, %v526_v31  ;;  %v1207_v44 = vpack.c.bf16 %v1919_v38, %v1913_v32 }
 0x151   : > { %1244 = vst [vmem:[%s1921_s29 + $0x8] sm:$0xff] %v1172_v35   ;;  %1252 = vst [vmem:[%s1921_s29 + $0x48] sm:$0xff] %v1212_v37  }
 0x152   : > { %v654_v47 = vadd.f32 %v1301_v29, %v653_v41  ;;  %v723_v48 = vadd.f32 %v692_v42, %v691_v40  ;;  %1168 = vst [vmem:[%s1921_s29] sm:$0xff] %v1167_v43   ;;  %1251 = vst [vmem:[%s1921_s29 + $0x40] sm:$0xff] %v1207_v44  }
 0x154   : > { %v724_v50 = vadd.f32 %v723_v48, %v693_v45  ;;  %v1305_v51 = vpop.f32.mrb[4].mxu0  ;;  %v655_v46 = vadd.f32 %v1302_v33, %v654_v47  ;;  %v1929_v52 = vpop.f32.mrb[4].mxu1 }
 0x155   : > { %v542_v53 = vpop.f32.mrb[5].mxu0  ;;  %v1931_v54 = vpop.f32.mrb[5].mxu1  ;;  %v697_v4 = vmul.f32 %v1305_v51, %v1305_v51 }
 0x156   : > { %v656_v55 = vadd.f32 %v655_v46, %v542_v53  ;;  %v695_v56 = vmul.f32 %v542_v53, %v542_v53  ;;  %v725_v58 = vadd.f32 %v724_v50, %v694_v49  ;;  %v1306_v59 = vpop.f32.mrb[6].mxu0  ;;  %v1933_v60 = vpop.f32.mrb[6].mxu1 }
 0x157   : > { %v1182_v61 = vpack.c.bf16 %v1306_v59, %v1305_v51  ;;  %v545_v62 = vpop.f32.mrb[7].mxu0  ;;  %v1222_v63 = vpack.c.bf16 %v1933_v60, %v1929_v52  ;;  %v1937_v39 = vpop.f32.mrb[7].mxu1  ;;  %v698_v8 = vmul.f32 %v1306_v59, %v1306_v59 }
 0x158   : > { %v726_v57 = vadd.f32 %v725_v58, %v695_v56  ;;  %v657_v0 = vadd.f32 %v656_v55, %v545_v62  ;;  %v696_v1 = vmul.f32 %v545_v62, %v545_v62  ;;  %v1177_v2 = vpack.c.bf16 %v545_v62, %v542_v53 }
 0x159   : > { %1246 = vst [vmem:[%s1921_s29 + $0x18] sm:$0xff] %v1182_v61   ;;  %1254 = vst [vmem:[%s1921_s29 + $0x58] sm:$0xff] %v1222_v63   ;;  %v1217_v3 = vpack.c.bf16 %v1937_v39, %v1931_v54 }
 0x15a   : > { %v658_v5 = vadd.f32 %v1305_v51, %v657_v0  ;;  %v727_v7 = vadd.f32 %v726_v57, %v696_v1  ;;  %1245 = vst [vmem:[%s1921_s29 + $0x10] sm:$0xff] %v1177_v2   ;;  %v707_v2 = vmul.f32 %v1913_v32, %v1913_v32 }
 0x15b   : > { %1253 = vst [vmem:[%s1921_s29 + $0x50] sm:$0xff] %v1217_v3  }
 0x15c   : > { %v728_v10 = vadd.f32 %v727_v7, %v697_v4  ;;  %v1309_v11 = vpop.f32.mrb[8].mxu0  ;;  %v659_v12 = vadd.f32 %v1306_v59, %v658_v5  ;;  %v1945_v13 = vpop.f32.mrb[8].mxu1 }
 0x15d   : > { %v558_v14 = vpop.f32.mrb[9].mxu0  ;;  %v1947_v15 = vpop.f32.mrb[9].mxu1  ;;  %v701_v9 = vmul.f32 %v1309_v11, %v1309_v11 }
 0x15e   : > { %v660_v16 = vadd.f32 %v659_v12, %v558_v14  ;;  %v699_v17 = vmul.f32 %v558_v14, %v558_v14  ;;  %v729_v18 = vadd.f32 %v728_v10, %v698_v8  ;;  %v1310_v19 = vpop.f32.mrb[10].mxu0  ;;  %v1949_v20 = vpop.f32.mrb[10].mxu1 }
 0x15f   : > { %v1192_v21 = vpack.c.bf16 %v1310_v19, %v1309_v11  ;;  %v561_v22 = vpop.f32.mrb[11].mxu0  ;;  %v1232_v23 = vpack.c.bf16 %v1949_v20, %v1945_v13  ;;  %v1953_v6 = vpop.f32.mrb[11].mxu1  ;;  %v702_v33 = vmul.f32 %v1310_v19, %v1310_v19 }
 0x160   : > { %v730_v24 = vadd.f32 %v729_v18, %v699_v17  ;;  %v661_v25 = vadd.f32 %v660_v16, %v561_v22  ;;  %v700_v26 = vmul.f32 %v561_v22, %v561_v22  ;;  %v1187_v27 = vpack.c.bf16 %v561_v22, %v558_v14 }
 0x161   : > { %1248 = vst [vmem:[%s1921_s29 + $0x28] sm:$0xff] %v1192_v21   ;;  %1256 = vst [vmem:[%s1921_s29 + $0x68] sm:$0xff] %v1232_v23   ;;  %v1227_v28 = vpack.c.bf16 %v1953_v6, %v1947_v15 }
 0x162   : > { %v662_v29 = vadd.f32 %v1309_v11, %v661_v25  ;;  %v731_v31 = vadd.f32 %v730_v24, %v700_v26  ;;  %1247 = vst [vmem:[%s1921_s29 + $0x20] sm:$0xff] %v1187_v27  }
 0x163   : > { %1255 = vst [vmem:[%s1921_s29 + $0x60] sm:$0xff] %v1227_v28  }
 0x164   : > { %v732_v35 = vadd.f32 %v731_v31, %v701_v9  ;;  %v1313_v36 = vpop.f32.mrb[12].mxu0  ;;  %v663_v37 = vadd.f32 %v1310_v19, %v662_v29  ;;  %v1961_v40 = vpop.f32.mrb[12].mxu1 }
 0x165   : > { %v574_v41 = vpop.f32.mrb[13].mxu0  ;;  %v1963_v42 = vpop.f32.mrb[13].mxu1  ;;  %v705_v61 = vmul.f32 %v1313_v36, %v1313_v36 }
 0x166   : > { %v664_v43 = vadd.f32 %v663_v37, %v574_v41  ;;  %v703_v44 = vmul.f32 %v574_v41, %v574_v41  ;;  %v733_v45 = vadd.f32 %v732_v35, %v702_v33  ;;  %v1314_v47 = vpop.f32.mrb[14].mxu0  ;;  %v1967_v48 = vpop.f32.mrb[14].mxu1 }
 0x167   : > { %v1202_v49 = vpack.c.bf16 %v1314_v47, %v1313_v36  ;;  %v577_v50 = vpop.f32.mrb[15].mxu0  ;;  %v1242_v51 = vpack.c.bf16 %v1967_v48, %v1961_v40  ;;  %v1971_v46 = vpop.f32.mrb[15].mxu1  ;;  %v706_v57 = vmul.f32 %v1314_v47, %v1314_v47 }
 0x168   : > { %v734_v53 = vadd.f32 %v733_v45, %v703_v44  ;;  %v665_v55 = vadd.f32 %v664_v43, %v577_v50  ;;  %v704_v56 = vmul.f32 %v577_v50, %v577_v50  ;;  %v1197_v58 = vpack.c.bf16 %v577_v50, %v574_v41 }
 0x169   : > { %1250 = vst [vmem:[%s1921_s29 + $0x38] sm:$0xff] %v1202_v49   ;;  %1258 = vst [vmem:[%s1921_s29 + $0x78] sm:$0xff] %v1242_v51   ;;  %v1237_v59 = vpack.c.bf16 %v1971_v46, %v1963_v42 }
 0x16a   : > { %v666_v62 = vadd.f32 %v1313_v36, %v665_v55  ;;  %v735_v63 = vadd.f32 %v734_v53, %v704_v56  ;;  %1249 = vst [vmem:[%s1921_s29 + $0x30] sm:$0xff] %v1197_v58  }
 0x16b   : > { %1257 = vst [vmem:[%s1921_s29 + $0x70] sm:$0xff] %v1237_v59  }
 0x16c   : > { %v736_v0 = vadd.f32 %v735_v63, %v705_v61  ;;  %v667_v1 = vadd.f32 %v1314_v47, %v666_v62 }
 0x16d   : > { %1495 = shalt.err (!%p1492_p7)
}
 0x16e   : > { %s1496_s6 = scalar_lea.hbm %s1976_s27, 2048  ;;  %s1500_s29 = scalar_lea.hbm %s2113_s4, 4096 }
 0x16f   : > { %p1497_p9 = scmp.ne.s32.totalorder %s1976_s27, %s1496_s6  ;;  %p1501_p5 = scmp.lt.u32.totalorder %s1976_s27, %s2113_s4 }
 0x170   : > { %p1502_p11 = scmp.lt.u32.totalorder %s1500_s29, %s1496_s6  ;;  %p1504_p4 = scmp.lt.u32.totalorder %s1496_s6, %s1976_s27 }
 0x171   : > { %p1498_p2 = pnand %p1497_p9, %p1718_p12 }
 0x172   : > { %p1503_p1 = por %p1502_p11, %p1501_p5 }
 0x173   : > { %p1499_p0 = pneg %p1498_p2 }
 0x174   : > { %p1505_p6 = por %p1504_p4, %p1503_p1 }
 0x176   : > { %p1506_p8 = pnand %p1505_p6, %p1499_p0 }
 0x178   : > { %1509 = shalt.err (!%p1506_p8)
}
 0x179   : > { %s1594_s17 = smov 64   ;;  %s1595_s12 = smov 4   ;;  %v668_v3 = vadd.f32 %v667_v1, %v1913_v32  ;;  %v737_v4 = vadd.f32 %v736_v0, %v706_v57  ;;  %v708_v8 = vmul.f32 %v1919_v38, %v1919_v38  ;;  %v709_v10 = vmul.f32 %v1911_v30, %v1911_v30 }
 0x17a   : > { %1353 = dma.vmem_to_hbm [thread:$0]  (%p1718_p12), %s1978_s28, 2048, %s1976_s27, %s923_s11, %s1594_s17, %s1594_s17, %s1595_s12   ;;  %v710_v14 = vmul.f32 %v1915_v34, %v1915_v34  ;;  %v711_v32 = vmul.f32 %v1931_v54, %v1931_v54  ;;  %v712_v22 = vmul.f32 %v1937_v39, %v1937_v39  ;;  %v716_v29 = vmul.f32 %v1953_v6, %v1953_v6 }
 0x17b   : > { %v738_v5 = vadd.f32 %v737_v4, %v707_v2  ;;  %v669_v7 = vadd.f32 %v668_v3, %v1919_v38  ;;  %v720_v44 = vmul.f32 %v1971_v46, %v1971_v46  ;;  %v722_v47 = vmul.f32 %v1967_v48, %v1967_v48  ;;  %s1127_s28 = sshll.u32 %s1648_s22, 7  ;;  %s957_s27 = sshll.u32 %s1907_s15, 4  ;;  %s2066_s27 = int_to_ptr.vmem [resolvable:$true] %s957_s27 }
 0x17c   : > { %s2064_s26 = scalar_lea.hbm %s2114_s5, %s1127_s28  ;;  %s928_s14 = scalar_lea.sflag [#allocation9], %s1766_s23 }
 0x17d   : > { %v670_v11 = vadd.f32 %v1911_v30, %v669_v7  ;;  %v739_v12 = vadd.f32 %v738_v5, %v708_v8  ;;  %v713_v30 = vmul.f32 %v1929_v52, %v1929_v52  ;;  %s1510_s6 = scalar_lea.vmem %s2066_s27, 128  ;;  %s1596_s22 = smov [#allocation8]  }
 0x17e   : > { %p1511_p10 = scmp.ne.s32.totalorder %s2066_s27, %s1510_s6  ;;  %s1514_s7 = sshll.u32 %s1596_s22, 4  ;;  %s1515_s7 = int_to_ptr.vmem [resolvable:$false] %s1514_s7 }
 0x17f   : > { %v740_v16 = vadd.f32 %v739_v12, %v709_v10  ;;  %v671_v17 = vadd.f32 %v1915_v34, %v670_v11  ;;  %v714_v34 = vmul.f32 %v1933_v60, %v1933_v60  ;;  %s1516_s10 = scalar_lea.vmem %s1515_s7, 256  ;;  %p1517_p7 = scmp.lt.s32.totalorder %s2066_s27, %s1515_s7 }
 0x180   : > { %p1512_p13 = pnand %p1511_p10, %p1718_p12  ;;  %p1518_p9 = scmp.lt.s32.totalorder %s1516_s10, %s1510_s6 }
 0x181   : > { %v672_v18 = vadd.f32 %v671_v17, %v1931_v54  ;;  %v741_v19 = vadd.f32 %v740_v16, %v710_v14  ;;  %v715_v54 = vmul.f32 %v1947_v15, %v1947_v15 }
 0x182   : > { %p1513_p3 = pneg %p1512_p13  ;;  %p1519_p2 = por %p1518_p9, %p1517_p7 }
 0x183   : > { %v742_v21 = vadd.f32 %v741_v19, %v711_v32  ;;  %v673_v38 = vadd.f32 %v672_v18, %v1937_v39 }
 0x184   : > { %p1520_p0 = pnand %p1519_p2, %p1513_p3 }
 0x185   : > { %v674_v23 = vadd.f32 %v1929_v52, %v673_v38  ;;  %v743_v24 = vadd.f32 %v742_v21, %v712_v22  ;;  %v717_v52 = vmul.f32 %v1945_v13, %v1945_v13 }
 0x187   : > { %v744_v25 = vadd.f32 %v743_v24, %v713_v30  ;;  %v675_v26 = vadd.f32 %v1933_v60, %v674_v23  ;;  %v718_v60 = vmul.f32 %v1949_v20, %v1949_v20 }
 0x189   : > { %v676_v27 = vadd.f32 %v675_v26, %v1947_v15  ;;  %v745_v28 = vadd.f32 %v744_v25, %v714_v34  ;;  %v719_v15 = vmul.f32 %v1963_v42, %v1963_v42 }
 0x18b   : > { %v746_v9 = vadd.f32 %v745_v28, %v715_v54  ;;  %v677_v39 = vadd.f32 %v676_v27, %v1953_v6 }
 0x18d   : > { %v678_v31 = vadd.f32 %v1945_v13, %v677_v39  ;;  %v747_v33 = vadd.f32 %v746_v9, %v716_v29  ;;  %v721_v13 = vmul.f32 %v1961_v40, %v1961_v40 }
 0x18f   : > { %v748_v35 = vadd.f32 %v747_v33, %v717_v52  ;;  %v679_v36 = vadd.f32 %v1949_v20, %v678_v31 }
 0x191   : > { %v680_v37 = vadd.f32 %v679_v36, %v1963_v42  ;;  %v749_v41 = vadd.f32 %v748_v35, %v718_v60 }
 0x193   : > { %v750_v43 = vadd.f32 %v749_v41, %v719_v15  ;;  %v681_v6 = vadd.f32 %v680_v37, %v1971_v46 }
 0x195   : > { %v682_v45 = vadd.f32 %v1961_v40, %v681_v6  ;;  %v751_v20 = vadd.f32 %v750_v43, %v720_v44 }
 0x197   : > { %v683_v42 = vadd.f32 %v1967_v48, %v682_v45  ;;  %v752_v49 = vadd.f32 %v751_v20, %v721_v13 }
 0x199   : > { %v684_v50 = vrot.slane %v683_v42, 4  ;;  %v753_v51 = vadd.f32 %v752_v49, %v722_v47 }
 0x19b   : > { %v685_v53 = vadd.f32 %v684_v50, %v683_v42  ;;  %v754_v46 = vrot.slane %v753_v51, 4 }
 0x19d   : > { %v686_v55 = vrot.slane %v685_v53, 2  ;;  %v755_v56 = vadd.f32 %v754_v46, %v753_v51 }
 0x19f   : > { %v687_v58 = vadd.f32 %v686_v55, %v685_v53  ;;  %v756_v40 = vrot.slane %v755_v56, 2 }
 0x1a1   : > { %v688_v59 = vrot.slane %v687_v58, 1  ;;  %v757_v61 = vadd.f32 %v756_v40, %v755_v56 }
 0x1a3   : > { %v689_v62 = vadd.f32 %v688_v59, %v687_v58  ;;  %v758_v63 = vrot.slane %v757_v61, 1 }
 0x1a5   : > { %v759_v48 = vadd.f32 %v758_v63, %v757_v61  ;;  %690 = vst [vmem:[%s1907_s15] sm:$0x1] %v689_v62 }
 0x1a7   : > { %760 = vst [vmem:[%s1907_s15 + $0x1] sm:$0x1] %v759_v48 }
 0x1a8   : > { %1523 = shalt.err (!%p1520_p0)
}
 0x1a9   : > { %s1524_s23 = scalar_lea.hbm %s2064_s26, 128  ;;  %s1528_s13 = scalar_lea.hbm %s2114_s5, 256 }
 0x1aa   : > { %p1525_p5 = scmp.ne.s32.totalorder %s2064_s26, %s1524_s23  ;;  %p1529_p4 = scmp.lt.u32.totalorder %s2064_s26, %s2114_s5 }
 0x1ab   : > { %p1530_p6 = scmp.lt.u32.totalorder %s1528_s13, %s1524_s23  ;;  %p1532_p10 = scmp.lt.u32.totalorder %s1524_s23, %s2064_s26 }
 0x1ac   : > { %p1526_p11 = pnand %p1525_p5, %p1718_p12 }
 0x1ad   : > { %p1531_p8 = por %p1530_p6, %p1529_p4 }
 0x1ae   : > { %p1527_p1 = pneg %p1526_p11 }
 0x1af   : > { %p1533_p13 = por %p1532_p10, %p1531_p8 }
 0x1b1   : > { %p1534_p3 = pnand %p1533_p13, %p1527_p1 }
 0x1b3   : > { %1537 = shalt.err (!%p1534_p3)
}
 0x1b4   : > { %1354 = dma.vmem_to_hbm [thread:$0]  (%p1718_p12), %s2066_s27, 128, %s2064_s26, %s928_s14  }
 0x1b5 PF: > { %s969_s12 = sand.u32 1, %s1572_s18   ;;  %p2129_p7 = scmp.ne.s32.totalorder %s2119_s25, 0 }
 0x1b6   : > { %p2130_p9 = scmp.ge.s32.totalorder %s1584_s21, 2  ;;  %s970_s28 = scalar_lea.sflag [#allocation4], %s969_s12 }
 0x1b8   : > { %p1366_p2 = pnand %p2130_p9, %p2129_p7 }
 0x1ba   : > { %1563 = dma.done.wait (!%p1366_p2), %s970_s28, 2048  }
 0x1bb   : > { %1565 = vsyncadd (!%p1366_p2), %s970_s28, 4294965248  ;;  %s979_s11 = scalar_lea.sflag [#allocation9], %s969_s12 }
 0x1bc   : > { %1567 = dma.done.wait (!%p1366_p2), %s979_s11, 128  }
 0x1bd   : > { %1569 = vsyncadd (!%p1366_p2), %s979_s11, 4294967168  ;;  %p23_p12 = scmp.ge.s32.totalorder %s1683_s30, 4   ;;  %s2131_s18 = smov %s1576_s19 }
 0x1be   : > { %s2132_s19 = smov %s1580_s20  ;;  %s2133_s20 = smov %s1714_s8 }
 0x1bf   : > { %s2134_s21 = smov %s1683_s30  ;;  %25 = sbr.rel (!%p23_p12) target bundleno = 8 (0x8), region = 102 }
 0x1c6   :  { %984 = vsyncpa [#allocation3], 1 }
 0x1c7   :  { %986 = vsyncpa [#allocation3 + $0x1], 1 }
 0x1c8   :  { %987 = vsyncpa [#allocation6], 1 }
 0x1c9   :  { %988 = vsyncpa [#allocation4], 1 }
 0x1ca   :  { %990 = vsyncpa [#allocation4 + $0x1], 1 }
 0x1cb   :  { %991 = vsyncpa [#allocation9], 1 }
 0x1cc   :  { %993 = vsyncpa [#allocation9 + $0x1], 1 }

</bundles_post_ra>
